<compile_context>
chip_gen: v7x
topology: tpu7x:2x2x1
jax: 0.10.0
libtpu: 0.0.40
codegen_flags: <defaults>
</compile_context>

<pallas_src>
import jax
import jax.numpy as jnp
from jax.experimental import pallas as pl
from jax.experimental.pallas import tpu as pltpu

EPS = 1e-5  # nn.BatchNorm2d default


# --------------------------- pass 1: conv + stats ---------------------------
def _conv_stats_kernel(x0_ref, x1_ref, x2_ref, w_ref, y_ref, sum_ref, sq_ref):
    """3x3 'SAME' conv on one image row (all N images) + partial BN stats.

    x{ky}_ref: (N, 1, W+2, Cin)  bf16   padded input rows h+ky
    w_ref    : (3, 3, Cin, Cout) bf16   conv taps
    y_ref    : (N, 1, W, Cout)   f32    conv output for image row h
    sum_ref  : (1, 1, Cout)      f32    partial per-channel sum (this step)
    sq_ref   : (1, 1, Cout)      f32    partial per-channel sum of squares
    """
    n, _, _, cin = x0_ref.shape
    wout = y_ref.shape[2]
    cout = y_ref.shape[3]

    rows = (x0_ref[...], x1_ref[...], x2_ref[...])
    acc = jnp.zeros((n * wout, cout), jnp.float32)
    for ky in range(3):
        row = rows[ky][:, 0]                                 # (N, W+2, Cin)
        for kx in range(3):
            patch = row[:, kx:kx + wout, :].reshape(n * wout, cin)
            acc = acc + jnp.dot(patch, w_ref[ky, kx],        # bf16 MXU, f32 acc
                                preferred_element_type=jnp.float32)

    y_ref[...] = acc.reshape(n, 1, wout, cout)
    sum_ref[...] = jnp.sum(acc, axis=0, keepdims=True).reshape(1, 1, cout)
    sq_ref[...] = jnp.sum(acc * acc, axis=0, keepdims=True).reshape(1, 1, cout)


# ----------------------- pass 2: folded BN + residual -----------------------
def _bn_apply_kernel(y_ref, x_ref, scale_ref, bias_ref, out_ref):
    """out = y * scale + bias + x   (single FMA-shaped pair + add, all f32)."""
    out_ref[...] = y_ref[...] * scale_ref[...] + bias_ref[...] + x_ref[...]


def _largest_row_tile(total, target):
    """Largest divisor of `total` <= target that is a multiple of 8; falls
    back to `total` itself (a full-extent block is always legal)."""
    for cand in range(min(total, target), 0, -1):
        if total % cand == 0 and cand % 8 == 0:
            return cand
    return total


def residual_block(x_nchw, w1, g1, b1, a1, w2, g2, b2, a2):
    """SRGAN ResidualBlock forward.  block1 params (w1,g1,b1,a1) and block2's
    PReLU alpha (a2) are accepted for API fidelity but are dead in the
    PyTorch forward output, so they are not computed here."""
    del w1, g1, b1, a1, a2  # dead code in the original forward

    N, C, H, W = x_nchw.shape
    Cout = w2.shape[0]

    # Layout glue: NCHW -> NHWC (channels on lanes).
    # TODO(synk): elide these two HBM transposes if the surrounding model can
    # keep NHWC end-to-end.
    x = jnp.transpose(x_nchw, (0, 2, 3, 1)).astype(jnp.float32)

    # Spatial zero-pad for 'SAME' 3x3; bf16 for the MXU input stream.
    xpad = jnp.pad(x, ((0, 0), (1, 1), (1, 1), (0, 0))).astype(jnp.bfloat16)
    # torch (Cout, Cin, kh, kw) -> (kh, kw, Cin, Cout), bf16.
    w_taps = jnp.transpose(w2, (2, 3, 1, 0)).astype(jnp.bfloat16)

    # ---- pass 1: conv via shifted matmuls (no im2col in HBM) + partial stats
    y, ysum, ysq = pl.pallas_call(
        _conv_stats_kernel,
        grid=(H,),
        in_specs=[
            pl.BlockSpec((N, 1, W + 2, C), lambda h: (0, h, 0, 0)),      # ky=0
            pl.BlockSpec((N, 1, W + 2, C), lambda h: (0, h + 1, 0, 0)),  # ky=1
            pl.BlockSpec((N, 1, W + 2, C), lambda h: (0, h + 2, 0, 0)),  # ky=2
            pl.BlockSpec((3, 3, C, Cout), lambda h: (0, 0, 0, 0)),
        ],
        out_specs=[
            pl.BlockSpec((N, 1, W, Cout), lambda h: (0, h, 0, 0)),
            pl.BlockSpec((1, 1, Cout), lambda h: (h, 0, 0)),
            pl.BlockSpec((1, 1, Cout), lambda h: (h, 0, 0)),
        ],
        out_shape=[
            jax.ShapeDtypeStruct((N, H, W, Cout), jnp.float32),
            jax.ShapeDtypeStruct((H, 1, Cout), jnp.float32),
            jax.ShapeDtypeStruct((H, 1, Cout), jnp.float32),
        ],
        compiler_params=pltpu.CompilerParams(
            dimension_semantics=("parallel",)),
    )(xpad, xpad, xpad, w_taps)

    # ---- tiny global BN reduction + affine fold (per-channel, plain JAX)
    cnt = jnp.float32(N * H * W)
    mean = jnp.sum(ysum, axis=(0, 1)) / cnt                         # (Cout,)
    var = jnp.maximum(jnp.sum(ysq, axis=(0, 1)) / cnt - mean * mean, 0.0)
    scale = g2.astype(jnp.float32) * jax.lax.rsqrt(var + EPS)       # (Cout,)
    bias = b2.astype(jnp.float32) - mean * scale                    # (Cout,)

    # ---- pass 2: y*scale + bias + x on a lane-dense (N*H, W*C) view
    NH, WC = N * H, W * Cout
    y2 = y.reshape(NH, WC)
    x2 = x.reshape(NH, WC)
    scale_row = jnp.tile(scale, W).reshape(1, WC)   # per-(w,c) lane layout
    bias_row = jnp.tile(bias, W).reshape(1, WC)

    # Row tile: ~1 MiB per f32 array per buffer so the double-buffered
    # (y, x, out) footprint stays well under scoped VMEM on v5e/v6e/v7x.
    target = max(8, min(512, (1024 * 1024) // (WC * 4)))
    TB = _largest_row_tile(NH, target)

    out2 = pl.pallas_call(
        _bn_apply_kernel,
        grid=(NH // TB,),
        in_specs=[
            pl.BlockSpec((TB, WC), lambda i: (i, 0)),
            pl.BlockSpec((TB, WC), lambda i: (i, 0)),
            pl.BlockSpec((1, WC), lambda i: (0, 0)),
            pl.BlockSpec((1, WC), lambda i: (0, 0)),
        ],
        out_specs=pl.BlockSpec((TB, WC), lambda i: (i, 0)),
        out_shape=jax.ShapeDtypeStruct((NH, WC), jnp.float32),
        compiler_params=pltpu.CompilerParams(
            dimension_semantics=("parallel",)),
    )(y2, x2, scale_row, bias_row)

    out = out2.reshape(N, H, W, Cout)
    return jnp.transpose(out, (0, 3, 1, 2)).astype(x_nchw.dtype)


# ----------------------- pure-JAX reference (NCHW) --------------------------
def _ref_conv_bn(x, w, gamma, beta):
    y = jax.lax.conv_general_dilated(
        x, w, window_strides=(1, 1), padding="SAME",
        dimension_numbers=("NCHW", "OIHW", "NCHW"))
    mean = y.mean(axis=(0, 2, 3), keepdims=True)
    var = ((y - mean) ** 2).mean(axis=(0, 2, 3), keepdims=True)
    return (y - mean) * jax.lax.rsqrt(var + EPS) * gamma.reshape(1, -1, 1, 1) \
        + beta.reshape(1, -1, 1, 1)


def ref_residual_block(x, w1, g1, b1, a1, w2, g2, b2, a2):
    # block1's output is discarded by the PyTorch forward; only block2 + skip
    # reach the result.
    return _ref_conv_bn(x, w2, g2, b2) + x


if __name__ == "__main__":
    import numpy as np

    N, C, H, W = 2, 4, 16, 16
    key = jax.random.PRNGKey(0)
    kw1, kw2, kx = jax.random.split(key, 3)

    # Deterministic synthetic parameters (shapes match nn.Conv2d / BN / PReLU).
    w1 = jax.random.normal(kw1, (C, C, 3, 3), jnp.float32) * 0.1
    w2 = jax.random.normal(kw2, (C, C, 3, 3), jnp.float32) * 0.1
    g1 = jnp.ones((C,), jnp.float32)
    b1 = jnp.zeros((C,), jnp.float32)
    a1 = jnp.full((C,), 0.25, jnp.float32)   # PReLU default init (unused)
    g2 = jnp.ones((C,), jnp.float32)
    b2 = jnp.zeros((C,), jnp.float32)
    a2 = jnp.full((C,), 0.25, jnp.float32)   # unused (block2 has no activation)

    x = jax.random.normal(kx, (N, C, H, W), jnp.float32)

    fwd = jax.jit(residual_block)
    out = jax.block_until_ready(fwd(x, w1, g1, b1, a1, w2, g2, b2, a2))

    ref = ref_residual_block(x, w1, g1, b1, a1, w2, g2, b2, a2)
    assert out.shape == x.shape and out.dtype == x.dtype
    # bf16 MXU inputs (f32 accumulate) -> tolerance relaxed vs full-f32 ref.
    np.testing.assert_allclose(np.asarray(out), np.asarray(ref),
                               rtol=2e-2, atol=2e-2)
    print("KERNEL_OK")
</pallas_src>

<mosaic_0001>
module attributes {stable_mosaic.version = 11 : i64} {
  func.func @_conv_stats_kernel(%arg0: i32, %arg1: memref<2x1x18x4xbf16, #tpu.memory_space<vmem>>, %arg2: memref<2x1x18x4xbf16, #tpu.memory_space<vmem>>, %arg3: memref<2x1x18x4xbf16, #tpu.memory_space<vmem>>, %arg4: memref<3x3x4x4xbf16, #tpu.memory_space<vmem>>, %arg5: memref<2x1x16x4xf32, #tpu.memory_space<vmem>>, %arg6: memref<1x1x4xf32, #tpu.memory_space<vmem>>, %arg7: memref<1x1x4xf32, #tpu.memory_space<vmem>>) attributes {dimension_semantics = [#tpu.dimension_semantics<parallel>], iteration_bounds = array<i64: 16>, scalar_prefetch = 0 : i64, scratch_operands = 0 : i64, tpu.core_type = #tpu.core_type<tc>, window_params = [{transform_indices = @transform_0, window_bounds = array<i64: 2, 1, 18, 4>}, {transform_indices = @transform_1, window_bounds = array<i64: 2, 1, 18, 4>}, {transform_indices = @transform_2, window_bounds = array<i64: 2, 1, 18, 4>}, {pipeline_mode = #tpu.pipeline_mode<synchronous>, transform_indices = @transform_3, window_bounds = array<i64: 3, 3, 4, 4>}, {transform_indices = @transform_4, window_bounds = array<i64: 2, 1, 16, 4>}, {transform_indices = @transform_5, window_bounds = array<i64: 1, 1, 4>}, {transform_indices = @transform_6, window_bounds = array<i64: 1, 1, 4>}]} {
    %c0 = arith.constant 0 : index
    %c0_0 = arith.constant 0 : index
    %c0_1 = arith.constant 0 : index
    %c0_2 = arith.constant 0 : index
    %0 = vector.load %arg1[%c0, %c0_0, %c0_1, %c0_2] : memref<2x1x18x4xbf16, #tpu.memory_space<vmem>>, vector<2x1x18x4xbf16>
    %c0_3 = arith.constant 0 : index
    %c0_4 = arith.constant 0 : index
    %c0_5 = arith.constant 0 : index
    %c0_6 = arith.constant 0 : index
    %1 = vector.load %arg2[%c0_3, %c0_4, %c0_5, %c0_6] : memref<2x1x18x4xbf16, #tpu.memory_space<vmem>>, vector<2x1x18x4xbf16>
    %c0_7 = arith.constant 0 : index
    %c0_8 = arith.constant 0 : index
    %c0_9 = arith.constant 0 : index
    %c0_10 = arith.constant 0 : index
    %2 = vector.load %arg3[%c0_7, %c0_8, %c0_9, %c0_10] : memref<2x1x18x4xbf16, #tpu.memory_space<vmem>>, vector<2x1x18x4xbf16>
    %cst = arith.constant 0.000000e+00 : f32
    %3 = vector.broadcast %cst : f32 to vector<32x4xf32>
    %4 = vector.shape_cast %0 : vector<2x1x18x4xbf16> to vector<2x18x4xbf16>
    %5 = vector.extract_strided_slice %4 {offsets = [0, 0, 0], sizes = [2, 16, 4], strides = [1, 1, 1]} : vector<2x18x4xbf16> to vector<2x16x4xbf16>
    %6 = vector.shape_cast %5 : vector<2x16x4xbf16> to vector<32x4xbf16>
    %c0_11 = arith.constant 0 : index
    %c0_12 = arith.constant 0 : index
    %c0_13 = arith.constant 0 : index
    %c0_14 = arith.constant 0 : index
    %7 = vector.load %arg4[%c0_11, %c0_12, %c0_13, %c0_14] : memref<3x3x4x4xbf16, #tpu.memory_space<vmem>>, vector<1x1x4x4xbf16>
    %8 = vector.shape_cast %7 : vector<1x1x4x4xbf16> to vector<4x4xbf16>
    %cst_15 = arith.constant dense<0.000000e+00> : vector<32x4xf32>
    %9 = tpu.matmul %6, %8, %cst_15 {dimension_numbers = #tpu.dot_dimension_numbers<[1], [0], [0], [1], [0, 0, 1, 1], [], []>} : vector<32x4xbf16>, vector<4x4xbf16>, vector<32x4xf32> -> vector<32x4xf32>
    %10 = arith.addf %3, %9 : vector<32x4xf32>
    %11 = vector.extract_strided_slice %4 {offsets = [0, 1, 0], sizes = [2, 16, 4], strides = [1, 1, 1]} : vector<2x18x4xbf16> to vector<2x16x4xbf16>
    %12 = vector.shape_cast %11 : vector<2x16x4xbf16> to vector<32x4xbf16>
    %c0_16 = arith.constant 0 : index
    %c1 = arith.constant 1 : index
    %c0_17 = arith.constant 0 : index
    %c0_18 = arith.constant 0 : index
    %13 = vector.load %arg4[%c0_16, %c1, %c0_17, %c0_18] : memref<3x3x4x4xbf16, #tpu.memory_space<vmem>>, vector<1x1x4x4xbf16>
    %14 = vector.shape_cast %13 : vector<1x1x4x4xbf16> to vector<4x4xbf16>
    %cst_19 = arith.constant dense<0.000000e+00> : vector<32x4xf32>
    %15 = tpu.matmul %12, %14, %cst_19 {dimension_numbers = #tpu.dot_dimension_numbers<[1], [0], [0], [1], [0, 0, 1, 1], [], []>} : vector<32x4xbf16>, vector<4x4xbf16>, vector<32x4xf32> -> vector<32x4xf32>
    %16 = arith.addf %10, %15 : vector<32x4xf32>
    %17 = vector.extract_strided_slice %4 {offsets = [0, 2, 0], sizes = [2, 16, 4], strides = [1, 1, 1]} : vector<2x18x4xbf16> to vector<2x16x4xbf16>
    %18 = vector.shape_cast %17 : vector<2x16x4xbf16> to vector<32x4xbf16>
    %c0_20 = arith.constant 0 : index
    %c2 = arith.constant 2 : index
    %c0_21 = arith.constant 0 : index
    %c0_22 = arith.constant 0 : index
    %19 = vector.load %arg4[%c0_20, %c2, %c0_21, %c0_22] : memref<3x3x4x4xbf16, #tpu.memory_space<vmem>>, vector<1x1x4x4xbf16>
    %20 = vector.shape_cast %19 : vector<1x1x4x4xbf16> to vector<4x4xbf16>
    %cst_23 = arith.constant dense<0.000000e+00> : vector<32x4xf32>
    %21 = tpu.matmul %18, %20, %cst_23 {dimension_numbers = #tpu.dot_dimension_numbers<[1], [0], [0], [1], [0, 0, 1, 1], [], []>} : vector<32x4xbf16>, vector<4x4xbf16>, vector<32x4xf32> -> vector<32x4xf32>
    %22 = arith.addf %16, %21 : vector<32x4xf32>
    %23 = vector.shape_cast %1 : vector<2x1x18x4xbf16> to vector<2x18x4xbf16>
    %24 = vector.extract_strided_slice %23 {offsets = [0, 0, 0], sizes = [2, 16, 4], strides = [1, 1, 1]} : vector<2x18x4xbf16> to vector<2x16x4xbf16>
    %25 = vector.shape_cast %24 : vector<2x16x4xbf16> to vector<32x4xbf16>
    %c1_24 = arith.constant 1 : index
    %c0_25 = arith.constant 0 : index
    %c0_26 = arith.constant 0 : index
    %c0_27 = arith.constant 0 : index
    %26 = vector.load %arg4[%c1_24, %c0_25, %c0_26, %c0_27] : memref<3x3x4x4xbf16, #tpu.memory_space<vmem>>, vector<1x1x4x4xbf16>
    %27 = vector.shape_cast %26 : vector<1x1x4x4xbf16> to vector<4x4xbf16>
    %cst_28 = arith.constant dense<0.000000e+00> : vector<32x4xf32>
    %28 = tpu.matmul %25, %27, %cst_28 {dimension_numbers = #tpu.dot_dimension_numbers<[1], [0], [0], [1], [0, 0, 1, 1], [], []>} : vector<32x4xbf16>, vector<4x4xbf16>, vector<32x4xf32> -> vector<32x4xf32>
    %29 = arith.addf %22, %28 : vector<32x4xf32>
    %30 = vector.extract_strided_slice %23 {offsets = [0, 1, 0], sizes = [2, 16, 4], strides = [1, 1, 1]} : vector<2x18x4xbf16> to vector<2x16x4xbf16>
    %31 = vector.shape_cast %30 : vector<2x16x4xbf16> to vector<32x4xbf16>
    %c1_29 = arith.constant 1 : index
    %c1_30 = arith.constant 1 : index
    %c0_31 = arith.constant 0 : index
    %c0_32 = arith.constant 0 : index
    %32 = vector.load %arg4[%c1_29, %c1_30, %c0_31, %c0_32] : memref<3x3x4x4xbf16, #tpu.memory_space<vmem>>, vector<1x1x4x4xbf16>
    %33 = vector.shape_cast %32 : vector<1x1x4x4xbf16> to vector<4x4xbf16>
    %cst_33 = arith.constant dense<0.000000e+00> : vector<32x4xf32>
    %34 = tpu.matmul %31, %33, %cst_33 {dimension_numbers = #tpu.dot_dimension_numbers<[1], [0], [0], [1], [0, 0, 1, 1], [], []>} : vector<32x4xbf16>, vector<4x4xbf16>, vector<32x4xf32> -> vector<32x4xf32>
    %35 = arith.addf %29, %34 : vector<32x4xf32>
    %36 = vector.extract_strided_slice %23 {offsets = [0, 2, 0], sizes = [2, 16, 4], strides = [1, 1, 1]} : vector<2x18x4xbf16> to vector<2x16x4xbf16>
    %37 = vector.shape_cast %36 : vector<2x16x4xbf16> to vector<32x4xbf16>
    %c1_34 = arith.constant 1 : index
    %c2_35 = arith.constant 2 : index
    %c0_36 = arith.constant 0 : index
    %c0_37 = arith.constant 0 : index
    %38 = vector.load %arg4[%c1_34, %c2_35, %c0_36, %c0_37] : memref<3x3x4x4xbf16, #tpu.memory_space<vmem>>, vector<1x1x4x4xbf16>
    %39 = vector.shape_cast %38 : vector<1x1x4x4xbf16> to vector<4x4xbf16>
    %cst_38 = arith.constant dense<0.000000e+00> : vector<32x4xf32>
    %40 = tpu.matmul %37, %39, %cst_38 {dimension_numbers = #tpu.dot_dimension_numbers<[1], [0], [0], [1], [0, 0, 1, 1], [], []>} : vector<32x4xbf16>, vector<4x4xbf16>, vector<32x4xf32> -> vector<32x4xf32>
    %41 = arith.addf %35, %40 : vector<32x4xf32>
    %42 = vector.shape_cast %2 : vector<2x1x18x4xbf16> to vector<2x18x4xbf16>
    %43 = vector.extract_strided_slice %42 {offsets = [0, 0, 0], sizes = [2, 16, 4], strides = [1, 1, 1]} : vector<2x18x4xbf16> to vector<2x16x4xbf16>
    %44 = vector.shape_cast %43 : vector<2x16x4xbf16> to vector<32x4xbf16>
    %c2_39 = arith.constant 2 : index
    %c0_40 = arith.constant 0 : index
    %c0_41 = arith.constant 0 : index
    %c0_42 = arith.constant 0 : index
    %45 = vector.load %arg4[%c2_39, %c0_40, %c0_41, %c0_42] : memref<3x3x4x4xbf16, #tpu.memory_space<vmem>>, vector<1x1x4x4xbf16>
    %46 = vector.shape_cast %45 : vector<1x1x4x4xbf16> to vector<4x4xbf16>
    %cst_43 = arith.constant dense<0.000000e+00> : vector<32x4xf32>
    %47 = tpu.matmul %44, %46, %cst_43 {dimension_numbers = #tpu.dot_dimension_numbers<[1], [0], [0], [1], [0, 0, 1, 1], [], []>} : vector<32x4xbf16>, vector<4x4xbf16>, vector<32x4xf32> -> vector<32x4xf32>
    %48 = arith.addf %41, %47 : vector<32x4xf32>
    %49 = vector.extract_strided_slice %42 {offsets = [0, 1, 0], sizes = [2, 16, 4], strides = [1, 1, 1]} : vector<2x18x4xbf16> to vector<2x16x4xbf16>
    %50 = vector.shape_cast %49 : vector<2x16x4xbf16> to vector<32x4xbf16>
    %c2_44 = arith.constant 2 : index
    %c1_45 = arith.constant 1 : index
    %c0_46 = arith.constant 0 : index
    %c0_47 = arith.constant 0 : index
    %51 = vector.load %arg4[%c2_44, %c1_45, %c0_46, %c0_47] : memref<3x3x4x4xbf16, #tpu.memory_space<vmem>>, vector<1x1x4x4xbf16>
    %52 = vector.shape_cast %51 : vector<1x1x4x4xbf16> to vector<4x4xbf16>
    %cst_48 = arith.constant dense<0.000000e+00> : vector<32x4xf32>
    %53 = tpu.matmul %50, %52, %cst_48 {dimension_numbers = #tpu.dot_dimension_numbers<[1], [0], [0], [1], [0, 0, 1, 1], [], []>} : vector<32x4xbf16>, vector<4x4xbf16>, vector<32x4xf32> -> vector<32x4xf32>
    %54 = arith.addf %48, %53 : vector<32x4xf32>
    %55 = vector.extract_strided_slice %42 {offsets = [0, 2, 0], sizes = [2, 16, 4], strides = [1, 1, 1]} : vector<2x18x4xbf16> to vector<2x16x4xbf16>
    %56 = vector.shape_cast %55 : vector<2x16x4xbf16> to vector<32x4xbf16>
    %c2_49 = arith.constant 2 : index
    %c2_50 = arith.constant 2 : index
    %c0_51 = arith.constant 0 : index
    %c0_52 = arith.constant 0 : index
    %57 = vector.load %arg4[%c2_49, %c2_50, %c0_51, %c0_52] : memref<3x3x4x4xbf16, #tpu.memory_space<vmem>>, vector<1x1x4x4xbf16>
    %58 = vector.shape_cast %57 : vector<1x1x4x4xbf16> to vector<4x4xbf16>
    %cst_53 = arith.constant dense<0.000000e+00> : vector<32x4xf32>
    %59 = tpu.matmul %56, %58, %cst_53 {dimension_numbers = #tpu.dot_dimension_numbers<[1], [0], [0], [1], [0, 0, 1, 1], [], []>} : vector<32x4xbf16>, vector<4x4xbf16>, vector<32x4xf32> -> vector<32x4xf32>
    %60 = arith.addf %54, %59 : vector<32x4xf32>
    %61 = vector.shape_cast %60 : vector<32x4xf32> to vector<2x1x16x4xf32>
    %c0_54 = arith.constant 0 : index
    %c0_55 = arith.constant 0 : index
    %c0_56 = arith.constant 0 : index
    %c0_57 = arith.constant 0 : index
    %62 = vector.load %arg5[%c0_54, %c0_55, %c0_56, %c0_57] : memref<2x1x16x4xf32, #tpu.memory_space<vmem>>, vector<2x1x16x4xf32>
    tpu.vector_store %arg5[%c0_54, %c0_55, %c0_56, %c0_57], %61 {strides = array<i32>} : memref<2x1x16x4xf32, #tpu.memory_space<vmem>>, vector<2x1x16x4xf32>,
    %cst_58 = arith.constant dense<0.000000e+00> : vector<4xf32>
    %63 = vector.multi_reduction <add>, %60, %cst_58 [0] : vector<32x4xf32> to vector<4xf32>
    %64 = vector.shape_cast %63 : vector<4xf32> to vector<1x4xf32>
    %65 = vector.shape_cast %64 : vector<1x4xf32> to vector<1x1x4xf32>
    %c0_59 = arith.constant 0 : index
    %c0_60 = arith.constant 0 : index
    %c0_61 = arith.constant 0 : index
    %66 = vector.load %arg6[%c0_59, %c0_60, %c0_61] : memref<1x1x4xf32, #tpu.memory_space<vmem>>, vector<1x1x4xf32>
    tpu.vector_store %arg6[%c0_59, %c0_60, %c0_61], %65 {strides = array<i32>} : memref<1x1x4xf32, #tpu.memory_space<vmem>>, vector<1x1x4xf32>,
    %67 = arith.mulf %60, %60 : vector<32x4xf32>
    %cst_62 = arith.constant dense<0.000000e+00> : vector<4xf32>
    %68 = vector.multi_reduction <add>, %67, %cst_62 [0] : vector<32x4xf32> to vector<4xf32>
    %69 = vector.shape_cast %68 : vector<4xf32> to vector<1x4xf32>
    %70 = vector.shape_cast %69 : vector<1x4xf32> to vector<1x1x4xf32>
    %c0_63 = arith.constant 0 : index
    %c0_64 = arith.constant 0 : index
    %c0_65 = arith.constant 0 : index
    %71 = vector.load %arg7[%c0_63, %c0_64, %c0_65] : memref<1x1x4xf32, #tpu.memory_space<vmem>>, vector<1x1x4xf32>
    tpu.vector_store %arg7[%c0_63, %c0_64, %c0_65], %70 {strides = array<i32>} : memref<1x1x4xf32, #tpu.memory_space<vmem>>, vector<1x1x4xf32>,
    return
  }
  func.func @transform_0(%arg0: i32) -> (i32, i32, i32, i32) {
    %c0_i32 = arith.constant 0 : i32
    %c0_i32_0 = arith.constant 0 : i32
    %c0_i32_1 = arith.constant 0 : i32
    %c0_i32_2 = arith.constant 0 : i32
    return %c0_i32, %arg0, %c0_i32_0, %c0_i32_1 : i32, i32, i32, i32
  }
  func.func @transform_1(%arg0: i32) -> (i32, i32, i32, i32) {
    %c1_i32 = arith.constant 1 : i32
    %0 = arith.addi %arg0, %c1_i32 : i32
    %c0_i32 = arith.constant 0 : i32
    %c0_i32_0 = arith.constant 0 : i32
    %c0_i32_1 = arith.constant 0 : i32
    %c0_i32_2 = arith.constant 0 : i32
    return %c0_i32, %0, %c0_i32_0, %c0_i32_1 : i32, i32, i32, i32
  }
  func.func @transform_2(%arg0: i32) -> (i32, i32, i32, i32) {
    %c2_i32 = arith.constant 2 : i32
    %0 = arith.addi %arg0, %c2_i32 : i32
    %c0_i32 = arith.constant 0 : i32
    %c0_i32_0 = arith.constant 0 : i32
    %c0_i32_1 = arith.constant 0 : i32
    %c0_i32_2 = arith.constant 0 : i32
    return %c0_i32, %0, %c0_i32_0, %c0_i32_1 : i32, i32, i32, i32
  }
  func.func @transform_3(%arg0: i32) -> (i32, i32, i32, i32) {
    %c0_i32 = arith.constant 0 : i32
    %c0_i32_0 = arith.constant 0 : i32
    %c0_i32_1 = arith.constant 0 : i32
    %c0_i32_2 = arith.constant 0 : i32
    %c0_i32_3 = arith.constant 0 : i32
    return %c0_i32, %c0_i32_0, %c0_i32_1, %c0_i32_2 : i32, i32, i32, i32
  }
  func.func @transform_4(%arg0: i32) -> (i32, i32, i32, i32) {
    %c0_i32 = arith.constant 0 : i32
    %c0_i32_0 = arith.constant 0 : i32
    %c0_i32_1 = arith.constant 0 : i32
    %c0_i32_2 = arith.constant 0 : i32
    return %c0_i32, %arg0, %c0_i32_0, %c0_i32_1 : i32, i32, i32, i32
  }
  func.func @transform_5(%arg0: i32) -> (i32, i32, i32) {
    %c0_i32 = arith.constant 0 : i32
    %c0_i32_0 = arith.constant 0 : i32
    %c0_i32_1 = arith.constant 0 : i32
    return %arg0, %c0_i32, %c0_i32_0 : i32, i32, i32
  }
  func.func @transform_6(%arg0: i32) -> (i32, i32, i32) {
    %c0_i32 = arith.constant 0 : i32
    %c0_i32_0 = arith.constant 0 : i32
    %c0_i32_1 = arith.constant 0 : i32
    return %arg0, %c0_i32, %c0_i32_0 : i32, i32, i32
  }
}

module attributes {stable_mosaic.version = 11 : i64} {
  func.func @_bn_apply_kernel(%arg0: i32, %arg1: memref<32x64xf32, #tpu.memory_space<vmem>>, %arg2: memref<32x64xf32, #tpu.memory_space<vmem>>, %arg3: memref<1x64xf32, #tpu.memory_space<vmem>>, %arg4: memref<1x64xf32, #tpu.memory_space<vmem>>, %arg5: memref<32x64xf32, #tpu.memory_space<vmem>>) attributes {dimension_semantics = [#tpu.dimension_semantics<parallel>], iteration_bounds = array<i64: 1>, scalar_prefetch = 0 : i64, scratch_operands = 0 : i64, tpu.core_type = #tpu.core_type<tc>, window_params = [{transform_indices = @transform_0, window_bounds = array<i64: 32, 64>}, {transform_indices = @transform_1, window_bounds = array<i64: 32, 64>}, {pipeline_mode = #tpu.pipeline_mode<synchronous>, transform_indices = @transform_2, window_bounds = array<i64: 1, 64>}, {pipeline_mode = #tpu.pipeline_mode<synchronous>, transform_indices = @transform_3, window_bounds = array<i64: 1, 64>}, {transform_indices = @transform_4, window_bounds = array<i64: 32, 64>}]} {
    %c0 = arith.constant 0 : index
    %c0_0 = arith.constant 0 : index
    %0 = vector.load %arg1[%c0, %c0_0] : memref<32x64xf32, #tpu.memory_space<vmem>>, vector<32x64xf32>
    %c0_1 = arith.constant 0 : index
    %c0_2 = arith.constant 0 : index
    %1 = vector.load %arg3[%c0_1, %c0_2] : memref<1x64xf32, #tpu.memory_space<vmem>>, vector<1x64xf32>
    %2 = vector.broadcast %1 : vector<1x64xf32> to vector<32x64xf32>
    %3 = arith.mulf %0, %2 : vector<32x64xf32>
    %c0_3 = arith.constant 0 : index
    %c0_4 = arith.constant 0 : index
    %4 = vector.load %arg4[%c0_3, %c0_4] : memref<1x64xf32, #tpu.memory_space<vmem>>, vector<1x64xf32>
    %5 = vector.broadcast %4 : vector<1x64xf32> to vector<32x64xf32>
    %6 = arith.addf %3, %5 : vector<32x64xf32>
    %c0_5 = arith.constant 0 : index
    %c0_6 = arith.constant 0 : index
    %7 = vector.load %arg2[%c0_5, %c0_6] : memref<32x64xf32, #tpu.memory_space<vmem>>, vector<32x64xf32>
    %8 = arith.addf %6, %7 : vector<32x64xf32>
    %c0_7 = arith.constant 0 : index
    %c0_8 = arith.constant 0 : index
    %9 = vector.load %arg5[%c0_7, %c0_8] : memref<32x64xf32, #tpu.memory_space<vmem>>, vector<32x64xf32>
    tpu.vector_store %arg5[%c0_7, %c0_8], %8 {strides = array<i32>} : memref<32x64xf32, #tpu.memory_space<vmem>>, vector<32x64xf32>,
    return
  }
  func.func @transform_0(%arg0: i32) -> (i32, i32) {
    %c0_i32 = arith.constant 0 : i32
    %c0_i32_0 = arith.constant 0 : i32
    return %arg0, %c0_i32 : i32, i32
  }
  func.func @transform_1(%arg0: i32) -> (i32, i32) {
    %c0_i32 = arith.constant 0 : i32
    %c0_i32_0 = arith.constant 0 : i32
    return %arg0, %c0_i32 : i32, i32
  }
  func.func @transform_2(%arg0: i32) -> (i32, i32) {
    %c0_i32 = arith.constant 0 : i32
    %c0_i32_0 = arith.constant 0 : i32
    %c0_i32_1 = arith.constant 0 : i32
    return %c0_i32, %c0_i32_0 : i32, i32
  }
  func.func @transform_3(%arg0: i32) -> (i32, i32) {
    %c0_i32 = arith.constant 0 : i32
    %c0_i32_0 = arith.constant 0 : i32
    %c0_i32_1 = arith.constant 0 : i32
    return %c0_i32, %c0_i32_0 : i32, i32
  }
  func.func @transform_4(%arg0: i32) -> (i32, i32) {
    %c0_i32 = arith.constant 0 : i32
    %c0_i32_0 = arith.constant 0 : i32
    return %arg0, %c0_i32 : i32, i32
  }
}

</mosaic_0001>

<bundles_post_ra>
// kernel: tile.13
= control target key start
LH: loop header
LB: loop body
LE: loop exit
PB: predicated region body
PF: predicated region fallthrough
CT: control target
= control target key end

     0   :  { %s28_s0 = inlined_call_operand.vmem [shape: f32[4], index: 0, kind: input, shape index: {}]   ;;  %s29_s1 = inlined_call_operand.vmem [shape: f32[16,4], index: 1, kind: output, shape index: {}]  }
   0x1   :  { %v4_v0 = vld [vmem:[%s28_s0] ss:$0 sm:$0xff] }
   0x2   :  { %5 = vst [vmem:[%s29_s1] sm:$0xff] %v4_v0  ;;  %8 = vst [vmem:[%s29_s1 + $0x8] sm:$0xff] %v4_v0 }

// kernel: tile.14
= control target key start
LH: loop header
LB: loop body
LE: loop exit
PB: predicated region body
PF: predicated region fallthrough
CT: control target
= control target key end

     0   :  { %s131_s10 = smov 60   ;;  %s132_s11 = smov 52   ;;  %vm3_vm0 = vcmask 31744   ;;  %vm9_vm1 = vcmask 523744   ;;  %vm15_vm2 = vcmask 490944   ;;  %vm21_vm3 = vcmask 458144   ;;  %s207_s0 = inlined_call_operand.vmem [shape: f32[16,4], index: 0, kind: input, shape index: {}]   ;;  %s208_s1 = inlined_call_operand.vmem [shape: f32[1,64], index: 1, kind: output, shape index: {}]  }
   0x1   :  { %v101_v0 = vld [vmem:[%s207_s0 + $0xf] sm:$0x1]   ;;  %v103_v1 = vld [vmem:[%s207_s0 + $0xd] sm:$0x1]   ;;  %v102_v2 = vld [vmem:[%s207_s0 + $0xe] sm:$0x1]  }
   0x2   :  { %7 = vrot.lane.b32.xlu0 %v101_v0, %s131_s10  ;;  %19 = vrot.lane.b32.xlu1 %v103_v1, %s132_s11  ;;  %v104_v3 = vld [vmem:[%s207_s0 + $0xc] sm:$0x1]   ;;  %s133_s16 = smov 56   ;;  %s134_s17 = smov 48   ;;  %v105_v4 = vld [vmem:[%s207_s0 + $0xb] sm:$0x1]  }
   0x3   :  { %v106_v5 = vld [vmem:[%s207_s0 + $0xa] sm:$0x1]   ;;  %v2_v6 = vld [vmem:[%s207_s0] sm:$0x1]   ;;  %s135_s24 = smov 44   ;;  %s136_s25 = smov 40  }
   0x4   :  { %4 = vst.msk [vmem:[#allocation0] sm:$0x1] %vm3_vm0, %v2_v6   ;;  %v107_v7 = vld [vmem:[%s207_s0 + $0x9] sm:$0x1]   ;;  %v108_v8 = vld [vmem:[%s207_s0 + $0x8] sm:$0x1]  }
   0x5   :  { %s137_s30 = smov 36   ;;  %s138_s2 = smov 32   ;;  %v109_v9 = vld [vmem:[%s207_s0 + $0x7] sm:$0x1]   ;;  %v110_v10 = vld [vmem:[%s207_s0 + $0x6] sm:$0x1]  }
   0x6   :  { %13 = vrot.lane.b32.xlu0 %v102_v2, %s133_s16  ;;  %25 = vrot.lane.b32.xlu1 %v104_v3, %s134_s17  ;;  %s139_s7 = smov 28   ;;  %s140_s8 = smov 24   ;;  %v111_v11 = vld [vmem:[%s207_s0 + $0x5] sm:$0x1]   ;;  %v112_v12 = vld [vmem:[%s207_s0 + $0x4] sm:$0x1]  }
   0x7   :  { %s141_s13 = smov 20   ;;  %s142_s14 = smov 16   ;;  %v113_v13 = vld [vmem:[%s207_s0 + $0x3] sm:$0x1]   ;;  %v114_v14 = vld [vmem:[%s207_s0 + $0x2] sm:$0x1]  }
   0x8   :  { %s143_s19 = smov 12   ;;  %s144_s20 = smov 8   ;;  %v115_v15 = vld [vmem:[%s207_s0 + $0x1] sm:$0x1]   ;;  %vm27_vm4 = vcmask 425344   ;;  %vm33_vm5 = vcmask 392544  }
   0x9   :  { %s145_s0 = smov 4   ;;  %vm39_vm6 = vcmask 359744   ;;  %vm45_vm7 = vcmask 326944   ;;  %vm51_vm8 = vcmask 294144   ;;  %vm57_vm9 = vcmask 261344  }
   0xa   :  { %31 = vrot.lane.b32.xlu0 %v105_v4, %s135_s24  ;;  %37 = vrot.lane.b32.xlu1 %v106_v5, %s136_s25  ;;  %vm63_vm10 = vcmask 228544   ;;  %vm69_vm11 = vcmask 195744   ;;  %vm75_vm12 = vcmask 162944   ;;  %vm81_vm13 = vcmask 130144  }
   0xb   :  { %vm87_vm14 = vcmask 97344   ;;  %vm93_vm15 = vcmask 64544  }
   0xe   :  { %43 = vrot.lane.b32.xlu0 %v107_v7, %s137_s30  ;;  %49 = vrot.lane.b32.xlu1 %v108_v8, %s138_s2 }
  0x12   :  { %55 = vrot.lane.b32.xlu0 %v109_v9, %s139_s7  ;;  %61 = vrot.lane.b32.xlu1 %v110_v10, %s140_s8 }
  0x16   :  { %67 = vrot.lane.b32.xlu0 %v111_v11, %s141_s13  ;;  %73 = vrot.lane.b32.xlu1 %v112_v12, %s142_s14 }
  0x1a   :  { %79 = vrot.lane.b32.xlu0 %v113_v13, %s143_s19  ;;  %85 = vrot.lane.b32.xlu1 %v114_v14, %s144_s20 }
  0x1e   :  { %91 = vrot.lane.b32.xlu0 %v115_v15, %s145_s0 }
  0x74   :  { %v8_v16 = vpop.permute.xlu0 %7   ;;  %v20_v17 = vpop.permute.xlu1 %19  }
  0x75   :  { %10 = vst.msk [vmem:[#allocation0] sm:$0x1] %vm9_vm1, %v8_v16  }
  0x78   :  { %v14_v18 = vpop.permute.xlu0 %13   ;;  %v26_v19 = vpop.permute.xlu1 %25  }
  0x79   :  { %16 = vst.msk [vmem:[#allocation0] sm:$0x1] %vm15_vm2, %v14_v18  }
  0x7a   :  { %22 = vst.msk [vmem:[#allocation0] sm:$0x1] %vm21_vm3, %v20_v17  }
  0x7b   :  { %28 = vst.msk [vmem:[#allocation0] sm:$0x1] %vm27_vm4, %v26_v19  }
  0x7c   :  { %v32_v20 = vpop.permute.xlu0 %31   ;;  %v38_v21 = vpop.permute.xlu1 %37  }
  0x7d   :  { %34 = vst.msk [vmem:[#allocation0] sm:$0x1] %vm33_vm5, %v32_v20  }
  0x7e   :  { %40 = vst.msk [vmem:[#allocation0] sm:$0x1] %vm39_vm6, %v38_v21  }
  0x80   :  { %v44_v22 = vpop.permute.xlu0 %43   ;;  %v50_v23 = vpop.permute.xlu1 %49  }
  0x81   :  { %46 = vst.msk [vmem:[#allocation0] sm:$0x1] %vm45_vm7, %v44_v22  }
  0x82   :  { %52 = vst.msk [vmem:[#allocation0] sm:$0x1] %vm51_vm8, %v50_v23  }
  0x84   :  { %v56_v24 = vpop.permute.xlu0 %55   ;;  %v62_v25 = vpop.permute.xlu1 %61  }
  0x85   :  { %58 = vst.msk [vmem:[#allocation0] sm:$0x1] %vm57_vm9, %v56_v24  }
  0x86   :  { %64 = vst.msk [vmem:[#allocation0] sm:$0x1] %vm63_vm10, %v62_v25  }
  0x88   :  { %v68_v26 = vpop.permute.xlu0 %67   ;;  %v74_v27 = vpop.permute.xlu1 %73  }
  0x89   :  { %70 = vst.msk [vmem:[#allocation0] sm:$0x1] %vm69_vm11, %v68_v26  }
  0x8a   :  { %76 = vst.msk [vmem:[#allocation0] sm:$0x1] %vm75_vm12, %v74_v27  }
  0x8c   :  { %v80_v28 = vpop.permute.xlu0 %79   ;;  %v86_v29 = vpop.permute.xlu1 %85  }
  0x8d   :  { %82 = vst.msk [vmem:[#allocation0] sm:$0x1] %vm81_vm13, %v80_v28  }
  0x8e   :  { %88 = vst.msk [vmem:[#allocation0] sm:$0x1] %vm87_vm14, %v86_v29  }
  0x90   :  { %v92_v30 = vpop.permute.xlu0 %91  }
  0x91   :  { %94 = vst.msk [vmem:[#allocation0] sm:$0x1] %vm93_vm15, %v92_v30  }
  0x98   :  { %v98_v31 = vld [vmem:[#allocation0] sm:$0x1] }
  0x99   :  { %100 = vst [vmem:[%s208_s1] sm:$0x1] %v98_v31 }

// kernel: residual_block.2
= control target key start
LH: loop header
LB: loop body
LE: loop exit
PB: predicated region body
PF: predicated region fallthrough
CT: control target
= control target key end

     0   :  { %s1941_s21 = smov 0   ;;  %s1943_s22 = smov 0   ;;  %s2356_s0 = inlined_call_operand.vmem [shape: bf16[2,18,18,4], index: 0, kind: input, shape index: {}, may-alias: {0,1,2}]   ;;  %s2357_s1 = inlined_call_operand.vmem [shape: bf16[2,18,18,4], index: 1, kind: input, shape index: {}, may-alias: {0,1,2}]   ;;  %s2358_s2 = inlined_call_operand.vmem [shape: bf16[2,18,18,4], index: 2, kind: input, shape index: {}, may-alias: {0,1,2}]   ;;  %s2359_s3 = inlined_call_operand.vmem [shape: bf16[3,3,4,4], index: 3, kind: input, shape index: {}]   ;;  %s2360_s4 = inlined_call_operand.vmem [shape: f32[2,16,16,4], index: 4, kind: output, shape index: {0}]   ;;  %s2361_s5 = inlined_call_operand.vmem [shape: f32[16,1,4], index: 5, kind: output, shape index: {1}]   ;;  %s2362_s6 = inlined_call_operand.vmem [shape: f32[16,1,4], index: 6, kind: output, shape index: {2}]  }
   0x1   :  { %s1945_s23 = smov 0   ;;  %s1947_s24 = smov 0  }
   0x2   :  { %s1949_s25 = smov 0   ;;  %s1951_s26 = smov 0  }
   0x3   :  { %s1953_s27 = smov 0  }
   0x4 LB: > { %s1977_s28 = sadd.s32 4294967295, %s1904_s27   ;;  %s1980_s29 = sadd.s32 1, %s1904_s27   ;;  %s1904_s27 = sphi %s1953_s27, %s2377_s27   ;;  %s1900_s26 = sphi %s1951_s26, %s2376_s26   ;;  %s1896_s25 = sphi %s1949_s25, %s2375_s25   ;;  %s1892_s24 = sphi %s1947_s24, %s2374_s24   ;;  %s1888_s23 = sphi %s1945_s23, %s2373_s23   ;;  %s1884_s22 = sphi %s1943_s22, %s2372_s22   ;;  %s1880_s21 = sphi %s1941_s21, %s2371_s21  }
   0x5   : > { %s21_s30 = ssub.s32 %s1904_s27, %s1980_s29  ;;  %s24_s7 = sadd.s32 1, %s1900_s26 }
   0x6   : > { %p22_p0 = scmp.eq.s32.totalorder %s21_s30, 0  ;;  %p31_p1 = scmp.ne.s32.totalorder %s1900_s26, %s1896_s25 }
   0x7   : > { %p32_p2 = scmp.eq.s32.totalorder %s1904_s27, 0  ;;  %s48_s8 = sadd.s32 1, %s1980_s29 }
   0x8   : > { %s1990_s9 = scalar_select %p22_p0, %s1900_s26, %s24_s7  }
   0x9   : > { %p1997_p3 = por %p32_p2, %p31_p1  ;;  %s49_s11 = ssub.s32 %s1980_s29, %s48_s8 }
   0xa   : > { %p50_p4 = scmp.eq.s32.totalorder %s49_s11, 0  ;;  %s52_s12 = sadd.s32 1, %s1892_s24 }
   0xb   : > { %p59_p5 = scmp.ne.s32.totalorder %s1892_s24, %s1888_s23  ;;  %s75_s13 = sadd.s32 2, %s1904_s27 }
   0xc   : > { %s2007_s14 = scalar_select %p50_p4, %s1892_s24, %s52_s12  }
   0xd   : > { %p2011_p6 = por %p59_p5, %p32_p2  ;;  %s76_s16 = sadd.s32 2, %s1980_s29 }
   0xe   : > { %s77_s17 = ssub.s32 %s75_s13, %s76_s16  ;;  %s80_s18 = sadd.s32 1, %s1884_s22 }
   0xf   : > { %p78_p7 = scmp.eq.s32.totalorder %s77_s17, 0  ;;  %p87_p8 = scmp.ne.s32.totalorder %s1884_s22, %s1880_s21 }
  0x10   : > { %p138_p9 = scmp.eq.s32.totalorder %s1977_s28, 15  ;;  %p1587_p12 = scmp.ge.s32.totalorder %s1904_s27, 16 }
  0x11   : > { %s2021_s19 = scalar_select %p78_p7, %s1884_s22, %s80_s18  }
  0x12   : > { %p2025_p10 = por %p87_p8, %p32_p2  ;;  %p2032_p11 = por %p138_p9, %p31_p1 }
  0x13   : > { %215 = sbr.rel (%p1587_p12) target bundleno = 47 (0x2f), region = 20 }
  0x1a   : > { %218 = sbr.rel (!%p1997_p3) target bundleno = 33 (0x21), region = 24  ;;  %s220_s7 = sand.u32 (%p1997_p3), 1, %s1900_s26  }
  0x1b   : > { %s1782_s8 = smul.u32 (%p1997_p3), 12, %s1904_s27 }
  0x1c   : > { %s1781_s11 = smul.u32 (%p1997_p3), 24, %s220_s7 }
  0x1d   : > { %s225_s16 = scalar_lea.vmem (%p1997_p3), %s2356_s0, %s1782_s8 }
  0x1e   : > { %v241_v0 = vld [vmem:[%s225_s16] sm:$0xff] (%p1997_p3)   ;;  %v245_v1 = vld [vmem:[%s225_s16 + $0x8] sm:$0xf] (%p1997_p3)  ;;  %v247_v2 = vld [vmem:[%s225_s16 + $0xd8] sm:$0xff] (%p1997_p3)   ;;  %s222_s17 = scalar_lea.vmem (%p1997_p3), [#allocation2], %s1781_s11 }
  0x1f   : > { %242 = vst [vmem:[%s222_s17] sm:$0xff] (%p1997_p3), %v241_v0   ;;  %246 = vst [vmem:[%s222_s17 + $0x8] sm:$0xf] (%p1997_p3), %v245_v1  ;;  %v251_v3 = vld [vmem:[%s225_s16 + $0xe0] sm:$0xf] (%p1997_p3) }
  0x20   : > { %248 = vst [vmem:[%s222_s17 + $0xc] sm:$0xff] (%p1997_p3), %v247_v2   ;;  %252 = vst [vmem:[%s222_s17 + $0x14] sm:$0xf] (%p1997_p3), %v251_v3 }
  0x21 PF: > { %287 = sbr.rel (!%p2011_p6) target bundleno = 40 (0x28), region = 65  ;;  %s289_s10 = sand.u32 (%p2011_p6), 1, %s1892_s24  }
  0x22   : > { %s1482_s18 = smul.u32 (%p2011_p6), 12, %s1904_s27 }
  0x23   : > { %s1783_s7 = smul.u32 (%p2011_p6), 24, %s289_s10 }
  0x24   : > { %s1483_s13 = scalar_lea.vmem (%p2011_p6), %s2357_s1, %s1482_s18 }
  0x25   : > { %v1589_v4 = vld [vmem:[%s1483_s13 + $0xc] sm:$0xff] (%p2011_p6)   ;;  %v1591_v5 = vld [vmem:[%s1483_s13 + $0x14] sm:$0xf] (%p2011_p6)  ;;  %v1592_v6 = vld [vmem:[%s1483_s13 + $0xe4] sm:$0xff] (%p2011_p6)   ;;  %s291_s11 = scalar_lea.vmem (%p2011_p6), [#allocation3], %s1783_s7 }
  0x26   : > { %312 = vst [vmem:[%s291_s11] sm:$0xff] (%p2011_p6), %v1589_v4   ;;  %316 = vst [vmem:[%s291_s11 + $0x8] sm:$0xf] (%p2011_p6), %v1591_v5  ;;  %v1594_v7 = vld [vmem:[%s1483_s13 + $0xec] sm:$0xf] (%p2011_p6) }
  0x27   : > { %318 = vst [vmem:[%s291_s11 + $0xc] sm:$0xff] (%p2011_p6), %v1592_v6   ;;  %322 = vst [vmem:[%s291_s11 + $0x14] sm:$0xf] (%p2011_p6), %v1594_v7 }
  0x28 PF: > { %357 = sbr.rel (!%p2025_p10) target bundleno = 47 (0x2f), region = 106  ;;  %s359_s15 = sand.u32 (%p2025_p10), 1, %s1884_s22  }
  0x29   : > { %s1487_s16 = smul.u32 (%p2025_p10), 12, %s1904_s27 }
  0x2a   : > { %s1784_s17 = smul.u32 (%p2025_p10), 24, %s359_s15 }
  0x2b   : > { %s1488_s12 = scalar_lea.vmem (%p2025_p10), %s2358_s2, %s1487_s16 }
  0x2c   : > { %v1595_v8 = vld [vmem:[%s1488_s12 + $0x18] sm:$0xff] (%p2025_p10)   ;;  %v1597_v9 = vld [vmem:[%s1488_s12 + $0x20] sm:$0xf] (%p2025_p10)  ;;  %v1598_v10 = vld [vmem:[%s1488_s12 + $0xf0] sm:$0xff] (%p2025_p10)   ;;  %s361_s7 = scalar_lea.vmem (%p2025_p10), [#allocation4], %s1784_s17 }
  0x2d   : > { %382 = vst [vmem:[%s361_s7] sm:$0xff] (%p2025_p10), %v1595_v8   ;;  %386 = vst [vmem:[%s361_s7 + $0x8] sm:$0xf] (%p2025_p10), %v1597_v9  ;;  %v1600_v11 = vld [vmem:[%s1488_s12 + $0xf8] sm:$0xf] (%p2025_p10) }
  0x2e   : > { %388 = vst [vmem:[%s361_s7 + $0xc] sm:$0xff] (%p2025_p10), %v1598_v10   ;;  %392 = vst [vmem:[%s361_s7 + $0x14] sm:$0xf] (%p2025_p10), %v1600_v11 }
  0x2f PF: > { %p1601_p13 = scmp.ge.s32.totalorder %s1904_s27, 1  ;;  %p426_p0 = scmp.lt.s32.totalorder %s1904_s27, 17 }
  0x31   : > { %p427_p1 = pnand %p1601_p13, %p426_p0 }
  0x32   : > { %vm583_vm0 = vcmask (!%p427_p1), 1041408   ;;  %v1624_v12 = vld [vmem:[%s2359_s3 + $0x8] sm:$0x3] (!%p427_p1)  ;;  %v1603_v13 = vld [vmem:[%s2359_s3 + $0x2] sm:$0x3] (!%p427_p1)  ;;  %s433_s15 = sand.u32 (!%p427_p1), 1, %s1896_s25  }
  0x33   : > { %430 = sbr.rel (%p427_p1) target bundleno = 367 (0x16f), region = 147  ;;  %1776 = vmatprep.subr.msk.bf16.mxu0 (!%p427_p1), %vm583_vm0, %v1624_v12  ;;  %1772 = vmatprep.subr.msk.bf16.mxu1 (!%p427_p1), %vm583_vm0, %v1603_v13  ;;  %v930_v14 = vsel (!%p427_p1), %vm583_vm0, %v1624_v12, 0  ;;  %v585_v15 = vsel (!%p427_p1), %vm583_vm0, %v1603_v13, 0  ;;  %vm517_vm1 = vsmask.f32 (!%p427_p1), 3328  ;;  %s440_s16 = sand.u32 (!%p427_p1), 1, %s1888_s23  }
  0x34   : > { %s1785_s27 = smul.u32 (!%p427_p1), 24, %s433_s15  ;;  %1711 = vmatpush3.bf16.msra.mxu0 (!%p427_p1), %v930_v14  ;;  %1687 = vmatpush3.bf16.msra.mxu1 (!%p427_p1), %v585_v15  ;;  %v2077_v16 = vld [vmem:[%s2359_s3 + $0xa] sm:$0x3] (!%p427_p1)  ;;  %vm518_vm2 = vsmask.f32 (!%p427_p1), 7440  ;;  %vm576_vm3 = vcmask (!%p427_p1), 31744  }
  0x35   : > { %s1786_s18 = smul.u32 (!%p427_p1), 24, %s440_s16  ;;  %1777 = vmatprep.subr.msk.bf16.mxu0 (!%p427_p1), %vm583_vm0, %v2077_v16  ;;  %v2084_v17 = vld [vmem:[%s2359_s3] sm:$0x3] (!%p427_p1)  ;;  %vm2128_vm4 = vmor (!%p427_p1), %vm517_vm1, %vm518_vm2  ;;  %vm706_vm5 = vcmask (!%p427_p1), 1042432   ;;  %vm707_vm6 = vcmask (!%p427_p1), 1046532   ;;  %s447_s8 = sand.u32 (!%p427_p1), 1, %s1880_s21  }
  0x36   : > { %s2086_s20 = scalar_lea.vmem (!%p427_p1), [#allocation2], %s1785_s27  ;;  %1773 = vmatprep.subr.msk.bf16.mxu1 (!%p427_p1), %vm583_vm0, %v2084_v17  ;;  %vm2174_vm7 = vmor (!%p427_p1), %vm706_vm5, %vm707_vm6  ;;  %s1787_s11 = smul.u32 (!%p427_p1), 24, %s447_s8  ;;  %vm1366_vm8 = vcmask (!%p427_p1), 24576  }
  0x37   : > { %v2089_v18 = vld [vmem:[%s2086_s20] sm:$0xf] (!%p427_p1)  ;;  %v2092_v19 = vld [vmem:[%s2086_s20 + $0x4] sm:$0xf] (!%p427_p1)  ;;  %v2095_v20 = vld [vmem:[%s2086_s20 + $0x8] sm:$0x1] (!%p427_p1) }
  0x38   : > { %v521_v21 = vshrl.u32 (!%p427_p1), %v2089_v18, 16  ;;  %v524_v22 = vshll.u32 (!%p427_p1), %v2089_v18, 16  ;;  %v530_v23 = vshll.u32 (!%p427_p1), %v2092_v19, 16  ;;  %v534_v24 = vshrl.u32 (!%p427_p1), %v2092_v19, 16  ;;  %s2104_s23 = scalar_lea.vmem (!%p427_p1), [#allocation3], %s1786_s18  ;;  %s2210_s17 = scalar_lea.vmem (!%p427_p1), [#allocation4], %s1787_s11 }
  0x39   : > { %v540_v25 = vshll.u32 (!%p427_p1), %v2095_v20, 16  ;;  %v2107_v26 = vld [vmem:[%s2104_s23] sm:$0xf] (!%p427_p1)  ;;  %v2110_v27 = vld [vmem:[%s2104_s23 + $0x4] sm:$0xf] (!%p427_p1)  ;;  %s1602_s8 = sshll.u32 (!%p427_p1), %s433_s15, 5 }
  0x3a   : > { %v523_v28 = vrot.slane %v521_v21, 4  ;;  %v526_v29 = vrot.slane %v524_v22, 5  ;;  %v532_v30 = vrot.slane %v530_v23, 5  ;;  %v536_v31 = vrot.slane %v534_v24, 4  ;;  %v2113_v32 = vld [vmem:[%s2104_s23 + $0x8] sm:$0x1] }
  0x3b   : > { %v542_v33 = vrot.slane %v540_v25, 5  ;;  %v868_v34 = vshrl.u32 %v2107_v26, 16  ;;  %v871_v35 = vshll.u32 %v2107_v26, 16  ;;  %v877_v36 = vshll.u32 %v2110_v27, 16  ;;  %v2121_v41 = vld [vmem:[%s2086_s20 + $0xc] sm:$0xf] }
  0x3c   : > { %v527_v37 = vor.u32 %v526_v29, %v523_v28  ;;  %v537_v38 = vor.u32 %v536_v31, %v532_v30  ;;  %v881_v39 = vshrl.u32 %v2110_v27, 16  ;;  %v887_v40 = vshll.u32 %v2113_v32, 16  ;;  %v2124_v42 = vld [vmem:[%s2086_s20 + $0x10] sm:$0xf]  ;;  %v2133_v52 = vld [vmem:[%s2086_s20 + $0x14] sm:$0x1] }
  0x3d   : > { %v870_v44 = vrot.slane %v868_v34, 4  ;;  %v873_v45 = vrot.slane %v871_v35, 5  ;;  %v879_v46 = vrot.slane %v877_v36, 5  ;;  %v545_v53 = vshrl.u32 %v2121_v41, 16  ;;  %v2144_v60 = vld [vmem:[%s2104_s23 + $0xc] sm:$0xf] }
  0x3e   : > { %v528_v47 = vrot.slane %v527_v37, 4  ;;  %v538_v48 = vrot.slane %v537_v38, 4  ;;  %v883_v49 = vrot.slane %v881_v39, 4  ;;  %v889_v50 = vrot.slane %v887_v40, 5  ;;  %v2148_v5 = vld [vmem:[%s2104_s23 + $0x10] sm:$0xf] }
  0x3f   : > { %v874_v51 = vor.u32 %v873_v45, %v870_v44  ;;  %v548_v54 = vshll.u32 %v2121_v41, 16  ;;  %v554_v55 = vshll.u32 %v2124_v42, 16  ;;  %v558_v59 = vshrl.u32 %v2124_v42, 16  ;;  %v2154_v8 = vld [vmem:[%s2104_s23 + $0x14] sm:$0x1]  ;;  %s2298_s21 = scalar_lea.vmem [#allocation5], %s1602_s8 }
  0x40   : > { %v533_v56 = vsel %vm2128_vm4, %v528_v47, %v532_v30  ;;  %v543_v57 = vsel %vm2128_vm4, %v538_v48, %v542_v33  ;;  %v884_v58 = vor.u32 %v883_v49, %v879_v46  ;;  %v547_v63 = vrot.slane %v545_v53, 4  ;;  %v1614_v47 = vld [vmem:[%s2359_s3 + $0x4] sm:$0x3]  ;;  %p491_p2 = scmp.lt.s32.totalorder %s1977_s28, 15  ;;  %s1658_s10 = sshll.u32 (%p2032_p11), %s1977_s28, 4 }
  0x41   : > { %v1604_v61 = vcombine.low %v533_v56, %v543_v57  ;;  %v875_v62 = vrot.slane %v874_v51, 4  ;;  %v550_v0 = vrot.slane %v548_v54, 5  ;;  %v556_v2 = vrot.slane %v554_v55, 5  ;;  %s1401_s7 = scalar_lea.vmem (%p2032_p11), %s2360_s4, %s1658_s10 }
  0x42   : > { %v885_v1 = vrot.slane %v884_v58, 4  ;;  %v560_v3 = vrot.slane %v558_v59, 4  ;;  %v564_v4 = vshll.u32 %v2133_v52, 16  ;;  %v892_v9 = vshrl.u32 %v2144_v60, 16  ;;  %s492_s25 = scalar_select %p491_p2, %s1977_s28, 15 }
  0x43   : > { %1688 = vmatprep.mubr.msk.bf16.mxu1 %vm576_vm3, %v1604_v61  ;;  %v880_v6 = vsel %vm2128_vm4, %v875_v62, %v879_v46  ;;  %v551_v7 = vor.u32 %v550_v0, %v547_v63  ;;  %v895_v13 = vshll.u32 %v2144_v60, 16  ;;  %v901_v22 = vshll.u32 %v2148_v5, 16  ;;  %v1636_v62 = vld [vmem:[%s2359_s3 + $0xc] sm:$0x3]  ;;  %v2213_v63 = vld [vmem:[%s2210_s17] sm:$0xf] }
  0x44   : > { %v890_v10 = vsel %vm2128_vm4, %v885_v1, %v889_v50  ;;  %v561_v11 = vor.u32 %v560_v3, %v556_v2  ;;  %v566_v12 = vrot.slane %v564_v4, 5  ;;  %v894_v21 = vrot.slane %v892_v9, 4  ;;  %s493_s11 = scalar_lea.vmem %s2361_s5, %s492_s25 }
  0x45   : > { %v1625_v14 = vcombine.low %v880_v6, %v890_v10  ;;  %v552_v15 = vrot.slane %v551_v7, 4  ;;  %v897_v24 = vrot.slane %v895_v13, 5  ;;  %v905_v25 = vshrl.u32 %v2148_v5, 16 }
  0x46   : > { %v562_v23 = vrot.slane %v561_v11, 4  ;;  %v911_v28 = vshll.u32 %v2154_v8, 16  ;;  %v903_v30 = vrot.slane %v901_v22, 5  ;;  %v1608_v31 = vcombine.low %v2089_v18, %v2092_v19 }
  0x47   : > { %1712 = vmatprep.mubr.msk.bf16.mxu0 %vm576_vm3, %v1625_v14  ;;  %v557_v29 = vsel %vm2128_vm4, %v552_v15, %v556_v2  ;;  %v992_v33 = vrot.slane %v2113_v32, 5  ;;  %v898_v35 = vor.u32 %v897_v24, %v894_v21  ;;  %v907_v36 = vrot.slane %v905_v25, 4  ;;  %v2219_v2 = vld [vmem:[%s2210_s17 + $0x4] sm:$0xf] }
  0x48   : > { %v567_v34 = vsel %vm2128_vm4, %v562_v23, %v566_v12  ;;  %v653_v39 = vsel %vm583_vm0, %v2084_v17, 0  ;;  %v1629_v40 = vrot.slane %v2107_v26, 9  ;;  %v989_v44 = vrot.slane %v2110_v27, 5  ;;  %v1619_v14 = vld [vmem:[%s2359_s3 + $0x6] sm:$0x3] }
  0x49   : > { %v1605_v38 = vcombine.low %v557_v29, %v567_v34  ;;  %v899_v32 = vrot.slane %v898_v35, 4  ;;  %v908_v45 = vor.u32 %v907_v36, %v903_v30  ;;  %v913_v46 = vrot.slane %v911_v28, 5  ;;  %v512_v28 = vld [vmem:[%s2210_s17 + $0x8] sm:$0x1]  ;;  %v1641_v35 = vld [vmem:[%s2359_s3 + $0xe] sm:$0x3] }
  0x4a   : > { %v990_v48 = vsel %vm2174_vm7, %v1629_v40, %v989_v44  ;;  %v991_v49 = vrot.slane %v989_v44, 4  ;;  %v714_v51 = vrot.slane %v2095_v20, 5  ;;  %v1612_v54 = vrot.slane %v2089_v18, 9 }
  0x4b   : > { %1689 = vmatmul.mubr.msk.bf16.vlgmr.msra.gmra.mrb[0].mxu1 %vm576_vm3, %v1605_v38  ;;  %v904_v17 = vsel %vm2128_vm4, %v899_v32, %v903_v30  ;;  %v909_v50 = vrot.slane %v908_v45, 4  ;;  %v711_v55 = vrot.slane %v2092_v19, 5  ;;  %v996_v58 = vrot.slane %v2148_v5, 5  ;;  %v513_v38 = vld [vmem:[%s2210_s17 + $0xc] sm:$0xf] }
  0x4c   : > { %1693 = vmatpush3.bf16.msra.mxu1 %v653_v39  ;;  %1694 = vmatprep.mubr.msk.bf16.mxu1 %vm576_vm3, %v1608_v31  ;;  %v993_v53 = vsel %vm2174_vm7, %v991_v49, %v992_v33  ;;  %v1016_v61 = vsel %vm583_vm0, %v2077_v16, 0  ;;  %v999_v16 = vrot.slane %v2154_v8, 5  ;;  %v1630_v0 = vrot.slane %v2144_v60, 9  ;;  %v514_v39 = vld [vmem:[%s2210_s17 + $0x10] sm:$0xf] }
  0x4d   : > { %1774 = vmatprep.subr.msk.bf16.mxu1 %vm583_vm0, %v1614_v47  ;;  %v914_v56 = vsel %vm2128_vm4, %v909_v50, %v913_v46  ;;  %v1632_v57 = vcombine.low %v990_v48, %v993_v53  ;;  %v713_v20 = vrot.slane %v711_v55, 4  ;;  %v712_v18 = vsel %vm2174_vm7, %v1612_v54, %v711_v55 }
  0x4e   : > { %v1626_v59 = vcombine.low %v904_v17, %v914_v56  ;;  %v998_v1 = vrot.slane %v996_v58, 4  ;;  %v1609_v3 = vcombine.low %v2121_v41, %v2124_v42  ;;  %v1146_v4 = vshrl.u32 %v2213_v63, 16 }
  0x4f   : > { %v715_v19 = vsel %vm2174_vm7, %v713_v20, %v714_v51  ;;  %v1149_v6 = vshll.u32 %v2213_v63, 16  ;;  %v1159_v7 = vshrl.u32 %v2219_v2, 16  ;;  %v718_v9 = vrot.slane %v2124_v42, 5 }
  0x50   : > { %1713 = vmatmul.mubr.msk.bf16.vlgmr.msra.gmra.mrb[0].mxu0 %vm576_vm3, %v1626_v59  ;;  %v1615_v8 = vcombine.low %v712_v18, %v715_v19  ;;  %v1155_v10 = vshll.u32 %v2219_v2, 16  ;;  %v738_v11 = vsel %vm583_vm0, %v1614_v47, 0  ;;  %v997_v12 = vsel %vm2174_vm7, %v1630_v0, %v996_v58  ;;  %v515_v58 = vld [vmem:[%s2210_s17 + $0x14] sm:$0x1]  ;;  %v1648_v19 = vld [vmem:[%s2359_s3 + $0x10] sm:$0x3]  ;;  %s496_s17 = scalar_lea.vmem %s2362_s6, %s492_s25 }
  0x51   : > { %1717 = vmatpush3.bf16.msra.mxu0 %v1016_v61  ;;  %1718 = vmatprep.mubr.msk.bf16.mxu0 %vm576_vm3, %v1632_v57  ;;  %v1000_v13 = vsel %vm2174_vm7, %v998_v1, %v999_v16  ;;  %v1148_v15 = vrot.slane %v1146_v4, 4  ;;  %v1151_v21 = vrot.slane %v1149_v6, 5  ;;  %v1161_v22 = vrot.slane %v1159_v7, 4 }
  0x52   : > { %1778 = vmatprep.subr.msk.bf16.mxu0 %vm583_vm0, %v1636_v62  ;;  %v1157_v42 = vrot.slane %v1155_v10, 5  ;;  %v721_v23 = vrot.slane %v2133_v52, 5  ;;  %v1613_v24 = vrot.slane %v2121_v41, 9  ;;  %v720_v25 = vrot.slane %v718_v9, 4 }
  0x53   : > { %v1633_v29 = vcombine.low %v997_v12, %v1000_v13  ;;  %v1637_v30 = vcombine.low %v2213_v63, %v2219_v2  ;;  %v1090_v31 = vsel %vm583_vm0, %v1636_v62, 0  ;;  %v1152_v33 = vor.u32 %v1151_v21, %v1148_v15 }
  0x54   : > { %v1162_v34 = vor.u32 %v1161_v22, %v1157_v42  ;;  %v1165_v52 = vshll.u32 %v512_v28, 16  ;;  %v719_v41 = vsel %vm2174_vm7, %v1613_v24, %v718_v9  ;;  %v722_v36 = vsel %vm2174_vm7, %v720_v25, %v721_v23 }
  0x55   : > { %v1170_v40 = vshrl.u32 %v513_v38, 16  ;;  %v1173_v44 = vshll.u32 %v513_v38, 16  ;;  %v1183_v32 = vshrl.u32 %v514_v39, 16  ;;  %v1179_v45 = vshll.u32 %v514_v39, 16 }
  0x56   : > { %v1616_v46 = vcombine.low %v719_v41, %v722_v36  ;;  %v1153_v47 = vrot.slane %v1152_v33, 4  ;;  %v1163_v48 = vrot.slane %v1162_v34, 4  ;;  %v1167_v49 = vrot.slane %v1165_v52, 5 }
  0x57   : > { %1695 = vmatmul.mubr.msk.bf16.vlgmr.msra.gmra.mrb[0].mxu1 %vm576_vm3, %v1609_v3  ;;  %v1620_v17 = vcombine.low %v2107_v26, %v2110_v27  ;;  %v812_v50 = vsel %vm583_vm0, %v1619_v14, 0  ;;  %v1172_v51 = vrot.slane %v1170_v40, 4  ;;  %v1175_v53 = vrot.slane %v1173_v44, 5 }
  0x58   : > { %1699 = vmatpush3.bf16.msra.mxu1 %v738_v11  ;;  %1700 = vmatprep.mubr.msk.bf16.mxu1 %vm576_vm3, %v1615_v8  ;;  %v1181_v54 = vrot.slane %v1179_v45, 5  ;;  %v1185_v55 = vrot.slane %v1183_v32, 4  ;;  %v1158_v56 = vsel %vm2128_vm4, %v1153_v47, %v1157_v42  ;;  %v1168_v57 = vsel %vm2128_vm4, %v1163_v48, %v1167_v49 }
  0x59   : > { %1775 = vmatprep.subr.msk.bf16.mxu1 %vm583_vm0, %v1619_v14  ;;  %v1638_v59 = vcombine.low %v513_v38, %v514_v39  ;;  %v1642_v26 = vcombine.low %v1158_v56, %v1168_v57  ;;  %v1176_v27 = vor.u32 %v1175_v53, %v1172_v51  ;;  %v1189_v20 = vshll.u32 %v515_v58, 16 }
  0x5a   : > { %v1186_v61 = vor.u32 %v1185_v55, %v1181_v54  ;;  %v1208_v62 = vsel %vm583_vm0, %v1641_v35, 0  ;;  %v1267_v18 = vrot.slane %v2219_v2, 5  ;;  %v1621_v3 = vcombine.low %v2144_v60, %v2148_v5 }
  0x5b   : > { %v1177_v16 = vrot.slane %v1176_v27, 4  ;;  %v1191_v1 = vrot.slane %v1189_v20, 5  ;;  %v1646_v4 = vrot.slane %v2213_v63, 9  ;;  %v1270_v6 = vrot.slane %v512_v28, 5 }
  0x5c   : > { %1719 = vmatmul.mubr.msk.bf16.vlgmr.msra.gmra.mrb[0].mxu0 %vm576_vm3, %v1633_v29  ;;  %v1187_v0 = vrot.slane %v1186_v61, 4  ;;  %v1269_v2 = vrot.slane %v1267_v18, 4  ;;  %v1274_v5 = vrot.slane %v514_v39, 5  ;;  %v1294_v63 = vsel %vm583_vm0, %v1648_v19, 0 }
  0x5d   : > { %1723 = vmatpush3.bf16.msra.mxu0 %v1090_v31  ;;  %1724 = vmatprep.mubr.msk.bf16.mxu0 %vm576_vm3, %v1637_v30  ;;  %v1182_v7 = vsel %vm2128_vm4, %v1177_v16, %v1181_v54  ;;  %v1268_v9 = vsel %vm2174_vm7, %v1646_v4, %v1267_v18  ;;  %v1647_v43 = vrot.slane %v513_v38, 9  ;;  %v1277_v13 = vrot.slane %v515_v58, 5 }
  0x5e   : > { %1779 = vmatprep.subr.msk.bf16.mxu0 %vm583_vm0, %v1641_v35  ;;  %v1192_v8 = vsel %vm2128_vm4, %v1187_v0, %v1191_v1  ;;  %v1271_v10 = vsel %vm2174_vm7, %v1269_v2, %v1270_v6  ;;  %v1276_v12 = vrot.slane %v1274_v5, 4 }
  0x5f   : > { %v1643_v11 = vcombine.low %v1182_v7, %v1192_v8  ;;  %v1649_v60 = vcombine.low %v1268_v9, %v1271_v10  ;;  %v1275_v14 = vsel %vm2174_vm7, %v1647_v43, %v1274_v5 }
  0x60   : > { %v1278_v15 = vsel %vm2174_vm7, %v1276_v12, %v1277_v13 }
  0x61   : > { %v1650_v21 = vcombine.low %v1275_v14, %v1278_v15 }
  0x63   : > { %1701 = vmatmul.mubr.msk.bf16.vlgmr.msra.gmra.mrb[0].mxu1 %vm576_vm3, %v1616_v46 }
  0x64   : > { %1705 = vmatpush3.bf16.msra.mxu1 %v812_v50  ;;  %1706 = vmatprep.mubr.msk.bf16.mxu1 %vm576_vm3, %v1620_v17 }
  0x68   : > { %1725 = vmatmul.mubr.msk.bf16.vlgmr.msra.gmra.mrb[0].mxu0 %vm576_vm3, %v1638_v59 }
  0x69   : > { %1729 = vmatpush3.bf16.msra.mxu0 %v1208_v62  ;;  %1730 = vmatprep.mubr.msk.bf16.mxu0 %vm576_vm3, %v1642_v26 }
  0x6a   : > { %1780 = vmatprep.subr.msk.bf16.mxu0 %vm583_vm0, %v1648_v19 }
  0x6f   : > { %1707 = vmatmul.mubr.msk.bf16.vlgmr.msra.gmra.mrb[0].mxu1 %vm576_vm3, %v1621_v3 }
  0x74   : > { %1731 = vmatmul.mubr.msk.bf16.vlgmr.msra.gmra.mrb[0].mxu0 %vm576_vm3, %v1643_v11 }
  0x75   : > { %1735 = vmatpush3.bf16.msra.mxu0 %v1294_v63  ;;  %1736 = vmatprep.mubr.msk.bf16.mxu0 %vm576_vm3, %v1649_v60 }
  0x80   : > { %1737 = vmatmul.mubr.msk.bf16.vlgmr.msra.gmra.mrb[0].mxu0 %vm576_vm3, %v1650_v21 }
 0x142   : > { %v1708_v42 = vpop.f32.mrb[0].mxu1 }
 0x143   : > { %v848_v22 = vpop.f32.mrb[1].mxu1 }
 0x144   : > { %v1709_v23 = vpop.f32.mrb[2].mxu1 }
 0x145   : > { %v851_v24 = vpop.f32.mrb[3].mxu1 }
 0x153   : > { %v1738_v25 = vpop.f32.mrb[0].mxu0 }
 0x154   : > { %v1740_v28 = vadd.f32 %v1738_v25, %v1708_v42  ;;  %v1330_v29 = vpop.f32.mrb[1].mxu0 }
 0x155   : > { %v1741_v30 = vadd.f32 %v1330_v29, %v848_v22  ;;  %v1739_v31 = vpop.f32.mrb[2].mxu0 }
 0x156   : > { %1351 = vst.msk [vmem:[%s2298_s21 + $0x10] sm:$0xff] %vm576_vm3, %v1740_v28  ;;  %v1742_v37 = vadd.f32 %v1739_v31, %v1709_v23  ;;  %v1333_v33 = vpop.f32.mrb[3].mxu0  ;;  %v1370_v35 = vmul.f32 %v1740_v28, %v1740_v28  ;;  %v1356_v40 = vsel %vm576_vm3, %v1740_v28, 0.0 }
 0x157   : > { %1349 = vst.msk [vmem:[%s2298_s21] sm:$0xff] %vm576_vm3, %v1741_v30  ;;  %v1368_v34 = vmul.f32 %v1741_v30, %v1741_v30  ;;  %v1743_v52 = vadd.f32 %v1333_v33, %v851_v24  ;;  %v1353_v41 = vsel %vm576_vm3, %v1741_v30, 0.0 }
 0x158   : > { %1352 = vst.msk [vmem:[%s2298_s21 + $0x18] sm:$0xff] %vm576_vm3, %v1742_v37  ;;  %v1371_v32 = vmul.f32 %v1742_v37, %v1742_v37  ;;  %v1375_v48 = vsel %vm576_vm3, %v1370_v35, 0.0  ;;  %v1358_v49 = vsel %vm576_vm3, %v1742_v37, 0.0 }
 0x159   : > { %1350 = vst.msk [vmem:[%s2298_s21 + $0x8] sm:$0xff] %vm576_vm3, %v1743_v52  ;;  %v1354_v36 = vsel %vm576_vm3, %v1743_v52, 0.0  ;;  %v1369_v38 = vmul.f32 %v1743_v52, %v1743_v52  ;;  %v1372_v44 = vsel %vm576_vm3, %v1368_v34, 0.0 }
 0x15a   : > { %v1355_v39 = vadd.f32 %v1354_v36, %v1353_v41  ;;  %v1377_v51 = vsel %vm576_vm3, %v1371_v32, 0.0 }
 0x15b   : > { %v1373_v45 = vsel %vm576_vm3, %v1369_v38, 0.0 }
 0x15c   : > { %v1357_v46 = vadd.f32 %v1356_v40, %v1355_v39  ;;  %v1374_v47 = vadd.f32 %v1373_v45, %v1372_v44 }
 0x15d   : > { %v1439_v0 = vld [vmem:[%s2298_s21 + $0x10] sm:$0xff] (%p2032_p11) }
 0x15e   : > { %v1359_v17 = vadd.f32 %v1358_v49, %v1357_v46  ;;  %v1376_v50 = vadd.f32 %v1375_v48, %v1374_v47  ;;  %v1435_v19 = vld [vmem:[%s2298_s21] sm:$0xff] (%p2032_p11)  ;;  %1440 = vst [vmem:[%s1401_s7 + $0x100] sm:$0xff] (%p2032_p11), %v1439_v0 }
 0x15f   : > { %v1441_v1 = vld [vmem:[%s2298_s21 + $0x18] sm:$0xff] (%p2032_p11)  ;;  %1436 = vst [vmem:[%s1401_s7] sm:$0xff] (%p2032_p11), %v1435_v19 }
 0x160   : > { %v1360_v53 = vrot.slane %v1359_v17, 4  ;;  %v1378_v54 = vadd.f32 %v1377_v51, %v1376_v50  ;;  %v1437_v16 = vld [vmem:[%s2298_s21 + $0x8] sm:$0xff] (%p2032_p11)  ;;  %1442 = vst [vmem:[%s1401_s7 + $0x108] sm:$0xff] (%p2032_p11), %v1441_v1 }
 0x161   : > { %1438 = vst [vmem:[%s1401_s7 + $0x8] sm:$0xff] (%p2032_p11), %v1437_v16 }
 0x162   : > { %v1361_v55 = vadd.f32 %v1360_v53, %v1359_v17  ;;  %v1379_v56 = vrot.slane %v1378_v54, 4 }
 0x164   : > { %v1362_v57 = vrot.slane %v1361_v55, 2  ;;  %v1380_v58 = vadd.f32 %v1379_v56, %v1378_v54 }
 0x166   : > { %v1363_v59 = vadd.f32 %v1362_v57, %v1361_v55  ;;  %v1381_v26 = vrot.slane %v1380_v58, 2 }
 0x168   : > { %v1364_v27 = vrot.slane %v1363_v59, 1  ;;  %v1382_v61 = vadd.f32 %v1381_v26, %v1380_v58  ;;  %1398 = sbr.rel (!%p2032_p11) target bundleno = 367 (0x16f), region = 163 }
 0x16a   : > { %v1365_v20 = vadd.f32 %v1364_v27, %v1363_v59  ;;  %v1383_v62 = vrot.slane %v1382_v61, 1 }
 0x16c   : > { %1367 = vst.msk [vmem:[%s493_s11] sm:$0x1] %vm1366_vm8, %v1365_v20  ;;  %v1384_v18 = vadd.f32 %v1383_v62, %v1382_v61 }
 0x16e   : > { %1385 = vst.msk [vmem:[%s496_s17] sm:$0x1] %vm1366_vm8, %v1384_v18 }
 0x16f PF: > { %p14_p3 = scmp.ge.s32.totalorder %s1980_s29, 18   ;;  %s2371_s21 = smov %s1884_s22 }
 0x170   : > { %s2372_s22 = smov %s2021_s19  ;;  %s2373_s23 = smov %s1892_s24 }
 0x171   : > { %s2374_s24 = smov %s2007_s14  ;;  %s2375_s25 = smov %s1900_s26 }
 0x172   : > { %s2376_s26 = smov %s1990_s9  ;;  %s2377_s27 = smov %s1980_s29 }
 0x173   :  { %16 = sbr.rel (!%p14_p3) target bundleno = 4 (0x4), region = 280 }

// kernel: residual_block.3
= control target key start
LH: loop header
LB: loop body
LE: loop exit
PB: predicated region body
PF: predicated region fallthrough
CT: control target
= control target key end

     0   :  { %vm51_vm0 = vcmask 523264   ;;  %s129_s0 = inlined_call_operand.vmem [shape: f32[32,64], index: 0, kind: input, shape index: {}]   ;;  %s130_s1 = inlined_call_operand.vmem [shape: f32[32,64], index: 1, kind: input, shape index: {}]   ;;  %s131_s2 = inlined_call_operand.vmem [shape: f32[1,64], index: 2, kind: input, shape index: {}]   ;;  %s132_s3 = inlined_call_operand.vmem [shape: f32[1,64], index: 3, kind: input, shape index: {}]   ;;  %s133_s4 = inlined_call_operand.vmem [shape: f32[32,64], index: 4, kind: output, shape index: {}]  }
   0x1   :  { %v17_v0 = vld [vmem:[%s129_s0] sm:$0xff]  ;;  %v18_v4 = vld [vmem:[%s129_s0 + $0x8] sm:$0xff]  ;;  %v19_v7 = vld [vmem:[%s129_s0 + $0x10] sm:$0xff] }
   0x2   :  { %v60_v1 = vld [vmem:[%s131_s2] ss:$0 sm:$0xff]  ;;  %v20_v8 = vld [vmem:[%s129_s0 + $0x18] sm:$0xff]  ;;  %v44_v10 = vld [vmem:[%s130_s1 + $0x8] sm:$0xff] }
   0x3   :  { %v61_v2 = vld [vmem:[%s132_s3] ss:$0 sm:$0xff]  ;;  %v28_v3 = vmul.f32 %v60_v1, %v17_v0  ;;  %v29_v6 = vmul.f32 %v60_v1, %v18_v4  ;;  %v30_v11 = vmul.f32 %v60_v1, %v19_v7  ;;  %v31_v12 = vmul.f32 %v60_v1, %v20_v8  ;;  %v45_v14 = vld [vmem:[%s130_s1 + $0x10] sm:$0xff]  ;;  %v46_v15 = vld [vmem:[%s130_s1 + $0x18] sm:$0xff] }
   0x4   :  { %v43_v5 = vld [vmem:[%s130_s1] sm:$0xff] }
   0x5   :  { %v39_v9 = vadd.f32 %v61_v2, %v28_v3  ;;  %v40_v13 = vadd.f32 %v61_v2, %v29_v6  ;;  %v41_v17 = vadd.f32 %v61_v2, %v30_v11  ;;  %v42_v18 = vadd.f32 %v61_v2, %v31_v12 }
   0x7   :  { %v47_v16 = vadd.f32 %v43_v5, %v39_v9  ;;  %v48_v19 = vadd.f32 %v44_v10, %v40_v13  ;;  %v49_v20 = vadd.f32 %v45_v14, %v41_v17  ;;  %v50_v21 = vadd.f32 %v46_v15, %v42_v18 }
   0x9   :  { %52 = vst.msk [vmem:[%s133_s4] sm:$0xff] %vm51_vm0, %v47_v16  ;;  %53 = vst.msk [vmem:[%s133_s4 + $0x8] sm:$0xff] %vm51_vm0, %v48_v19 }
   0xa   :  { %54 = vst.msk [vmem:[%s133_s4 + $0x10] sm:$0xff] %vm51_vm0, %v49_v20  ;;  %55 = vst.msk [vmem:[%s133_s4 + $0x18] sm:$0xff] %vm51_vm0, %v50_v21 }

</bundles_post_ra>
